<compile_context>
chip_gen: v7x
topology: tpu7x:2x2x1
jax: 0.10.0
libtpu: 0.0.40
codegen_flags: <defaults>
</compile_context>

<pallas_src>
import jax
import jax.numpy as jnp
from jax import lax
from jax.experimental import pallas as pl
from jax.experimental.pallas import tpu as pltpu


_LANE = 128
_SUB = 8


# ----------------------------- helpers ----------------------------------------

def _round_up(n, m):
    return ((n + m - 1) // m) * m


def _pad_to(a, axis, target):
    """Zero-pad `a` along `axis` up to size `target`."""
    if a.shape[axis] == target:
        return a
    cfg = [(0, 0)] * a.ndim
    cfg[axis] = (0, target - a.shape[axis])
    return jnp.pad(a, cfg)


def _vmem_limit_bytes():
    """~75% of physical VMEM: ~96 MiB on v5e/v6e (128 MiB), ~48 MiB on v7x (64 MiB)."""
    try:
        cap = int(pltpu.get_tpu_info().vmem_capacity_bytes)
    except Exception:
        cap = 64 * 1024 * 1024
    return max(32 * 1024 * 1024, min((cap * 3) // 4, 96 * 1024 * 1024))


# ----------------------------- kernels ---------------------------------------

def _shared_kernel(x_ref, w_ref, b_ref, o_ref):
    # x: (TM, S) bf16   w: (Pp, S) bf16 (resident)   b: (1, Pp) f32   o: (TM, Pp)
    # NT-form dot (contract last dims of both) feeds the MXU directly, same pattern
    # as flash-attention q @ k^T -> no per-step weight transpose.
    y = lax.dot_general(
        x_ref[...], w_ref[...],
        dimension_numbers=(((1,), (1,)), ((), ())),
        preferred_element_type=jnp.float32)
    o_ref[...] = (y + b_ref[...]).astype(o_ref.dtype)


def _individual_kernel(x_ref, w_ref, b_ref, o_ref):
    # x: (CB, Bp, S) bf16   w: (CB, TN, S) bf16   b: (CB, 1, TN) f32   o: (CB, Bp, TN)
    # One batched MXU dot (batch dim = channel): no per-channel accumulator live ranges
    # and no dynamic ref indexing.
    y = lax.dot_general(
        x_ref[...], w_ref[...],
        dimension_numbers=(((2,), (2,)), ((0,), (0,))),
        preferred_element_type=jnp.float32)
    o_ref[...] = (y + b_ref[...]).astype(o_ref.dtype)


# ----------------------------- pallas_call wrappers ----------------------------

def _shared_call(x2, Wp, bp, *, TM, BCp, Pp, S, out_dtype, single_buffer_resident):
    if single_buffer_resident:
        # Constant index_map -> the block never changes; one buffer is enough
        # (saves ~Pp*S bytes of VMEM, matters most on v7x).
        w_spec = pl.BlockSpec((Pp, S), lambda i: (0, 0), pipeline_mode=pl.Buffered(1))
        b_spec = pl.BlockSpec((1, Pp), lambda i: (0, 0), pipeline_mode=pl.Buffered(1))
    else:
        w_spec = pl.BlockSpec((Pp, S), lambda i: (0, 0))
        b_spec = pl.BlockSpec((1, Pp), lambda i: (0, 0))

    cost = pl.CostEstimate(
        flops=2 * BCp * S * Pp,
        transcendentals=0,
        bytes_accessed=2 * (BCp * S + Pp * S) + 4 * (Pp + BCp * Pp))

    out2 = pl.pallas_call(
        _shared_kernel,
        out_shape=jax.ShapeDtypeStruct((BCp, Pp), out_dtype),
        grid=(BCp // TM,),
        in_specs=[pl.BlockSpec((TM, S), lambda i: (i, 0)), w_spec, b_spec],
        out_specs=pl.BlockSpec((TM, Pp), lambda i: (i, 0)),
        compiler_params=pltpu.CompilerParams(
            dimension_semantics=("parallel",),
            vmem_limit_bytes=_vmem_limit_bytes()),
        cost_estimate=cost,
    )(x2, Wp, bp)
    return jax.block_until_ready(out2)


# ----------------------------- forward ----------------------------------------

def predict_forward(x, params, *, individual):
    """Forward pass of Predict: x (B, C, S) -> (B, C, P). Dropout = identity (eval)."""
    B, C, S = x.shape
    out_dtype = x.dtype

    if individual:
        W = params["weight"]                       # (C, P, S)
        bias = params["bias"]                      # (C, P)
        P = W.shape[1]
        Pp = _round_up(P, _LANE)                   # lane-dense output columns
        CB = 8                                     # channels per grid step
        Cp = _round_up(C, CB)                      # pad channels (zero weights)
        Bp = _round_up(B, _SUB)                    # sublane-full rows
        TN = 256 if (Pp % 256 == 0) else 128       # second grid axis over pred_len

        x_t = jnp.transpose(x, (1, 0, 2))          # (C, B, S) channel-major
        x_t = _pad_to(_pad_to(x_t, 0, Cp), 1, Bp).astype(jnp.bfloat16)
        Wp = _pad_to(_pad_to(W, 0, Cp), 1, Pp).astype(jnp.bfloat16)          # (Cp, Pp, S)
        bp = _pad_to(_pad_to(bias, 0, Cp), 1, Pp).astype(jnp.float32)
        bp = bp.reshape(Cp, 1, Pp)

        cost = pl.CostEstimate(
            flops=2 * Cp * Bp * S * Pp,
            transcendentals=0,
            bytes_accessed=2 * (Cp * Bp * S + Cp * Pp * S) + 4 * (Cp * Pp + Cp * Bp * Pp))

        out_t = pl.pallas_call(
            _individual_kernel,
            out_shape=jax.ShapeDtypeStruct((Cp, Bp, Pp), out_dtype),
            grid=(Cp // CB, Pp // TN),
            in_specs=[
                pl.BlockSpec((CB, Bp, S), lambda i, j: (i, 0, 0)),
                pl.BlockSpec((CB, TN, S), lambda i, j: (i, j, 0)),
                pl.BlockSpec((CB, 1, TN), lambda i, j: (i, 0, j)),
            ],
            out_specs=pl.BlockSpec((CB, Bp, TN), lambda i, j: (i, 0, j)),
            compiler_params=pltpu.CompilerParams(
                dimension_semantics=("parallel", "parallel"),
                vmem_limit_bytes=_vmem_limit_bytes()),
            cost_estimate=cost,
        )(x_t, Wp, bp)
        out_t = jax.block_until_ready(out_t)

        if (Cp, Bp, Pp) != (C, B, P):
            out_t = out_t[:C, :B, :P]
        return jnp.transpose(out_t, (1, 0, 2))     # (B, C, P)

    else:
        W = params["weight"]                       # (P, S)
        bias = params["bias"]                      # (P,)
        P = W.shape[0]
        Pp = _round_up(P, _LANE)                   # lane-dense output columns
        BC = B * C
        # Fixed, padded row tile: full MXU M, bounded VMEM, no full-extent fallback.
        TM = min(512, _round_up(BC, 256))          # TODO(synk): sweep TM=1024 on v5e/v6e
        BCp = _round_up(BC, TM)

        x2 = _pad_to(x.reshape(BC, S), 0, BCp).astype(jnp.bfloat16)
        Wp = _pad_to(W, 0, Pp).astype(jnp.bfloat16)                # (Pp, S), zero rows
        bp = _pad_to(bias, 0, Pp).astype(jnp.float32).reshape(1, Pp)

        try:
            out2 = _shared_call(x2, Wp, bp, TM=TM, BCp=BCp, Pp=Pp, S=S,
                                out_dtype=out_dtype, single_buffer_resident=True)
        except Exception:
            # Fallback if single-buffered resident blocks are rejected by this jax build.
            out2 = _shared_call(x2, Wp, bp, TM=TM, BCp=BCp, Pp=Pp, S=S,
                                out_dtype=out_dtype, single_buffer_resident=False)

        if (BCp, Pp) != (BC, P):
            out2 = out2[:BC, :P]
        return out2.reshape(B, C, P)


# ----------------------------- param init -------------------------------------

def init_predict_params(key, individual, c_out, seq_len, pred_len, dtype=jnp.float32):
    """Deterministic init mimicking nn.Linear shapes (weight: (out, in), bias: (out,))."""
    kw, kb = jax.random.split(key)
    bound = 1.0 / (seq_len ** 0.5)
    if individual:
        weight = jax.random.uniform(kw, (c_out, pred_len, seq_len),
                                    minval=-bound, maxval=bound, dtype=dtype)
        bias = jax.random.uniform(kb, (c_out, pred_len),
                                  minval=-bound, maxval=bound, dtype=dtype)
    else:
        weight = jax.random.uniform(kw, (pred_len, seq_len),
                                    minval=-bound, maxval=bound, dtype=dtype)
        bias = jax.random.uniform(kb, (pred_len,),
                                  minval=-bound, maxval=bound, dtype=dtype)
    return {"weight": weight, "bias": bias}


# ----------------------------- reference (plain JAX) ---------------------------

def predict_reference(x, params, *, individual):
    """Reference in the kernel's compute precision: bf16 inputs, f32 accumulation,
    f32 bias (difference to a pure-f32 reference is bounded by bf16 input rounding)."""
    xf = x.astype(jnp.bfloat16).astype(jnp.float32)
    Wf = params["weight"].astype(jnp.bfloat16).astype(jnp.float32)
    if individual:
        return jnp.einsum("bcs,cps->bcp", xf, Wf) + params["bias"][None, :, :]
    else:
        return jnp.einsum("bcs,ps->bcp", xf, Wf) + params["bias"][None, None, :]


# ----------------------------- main --------------------------------------------

if __name__ == "__main__":
    B, C_OUT, SEQ_LEN, PRED_LEN = 2, 4, 8, 16
    key = jax.random.PRNGKey(0)
    kx, kp1, kp2 = jax.random.split(key, 3)

    x = jax.random.normal(kx, (B, C_OUT, SEQ_LEN), dtype=jnp.float32)

    ok = True

    # individual = True (per-channel Linear)
    params_ind = init_predict_params(kp1, True, C_OUT, SEQ_LEN, PRED_LEN)
    out_ind = jax.block_until_ready(predict_forward(x, params_ind, individual=True))
    ref_ind = predict_reference(x, params_ind, individual=True)
    ok &= bool(jnp.allclose(out_ind, ref_ind, atol=1e-2, rtol=1e-2))
    ok &= (out_ind.shape == (B, C_OUT, PRED_LEN))

    # individual = False (shared Linear)
    params_sh = init_predict_params(kp2, False, C_OUT, SEQ_LEN, PRED_LEN)
    out_sh = jax.block_until_ready(predict_forward(x, params_sh, individual=False))
    ref_sh = predict_reference(x, params_sh, individual=False)
    ok &= bool(jnp.allclose(out_sh, ref_sh, atol=1e-2, rtol=1e-2))
    ok &= (out_sh.shape == (B, C_OUT, PRED_LEN))

    if ok:
        print("KERNEL_OK")
    else:
        print("KERNEL_MISMATCH")
</pallas_src>

<mosaic_0001>
module attributes {stable_mosaic.version = 11 : i64} {
  func.func @_individual_kernel(%arg0: i32, %arg1: i32, %arg2: memref<8x8x8xbf16, #tpu.memory_space<vmem>>, %arg3: memref<8x128x8xbf16, #tpu.memory_space<vmem>>, %arg4: memref<8x1x128xf32, #tpu.memory_space<vmem>>, %arg5: memref<8x8x128xf32, #tpu.memory_space<vmem>>) attributes {dimension_semantics = [#tpu.dimension_semantics<parallel>, #tpu.dimension_semantics<parallel>], iteration_bounds = array<i64: 1, 1>, scalar_prefetch = 0 : i64, scratch_operands = 0 : i64, tpu.core_type = #tpu.core_type<tc>, window_params = [{transform_indices = @transform_0, window_bounds = array<i64: 8, 8, 8>}, {transform_indices = @transform_1, window_bounds = array<i64: 8, 128, 8>}, {transform_indices = @transform_2, window_bounds = array<i64: 8, 1, 128>}, {transform_indices = @transform_3, window_bounds = array<i64: 8, 8, 128>}]} {
    %c0 = arith.constant 0 : index
    %c0_0 = arith.constant 0 : index
    %c0_1 = arith.constant 0 : index
    %0 = vector.load %arg2[%c0, %c0_0, %c0_1] : memref<8x8x8xbf16, #tpu.memory_space<vmem>>, vector<8x8x8xbf16>
    %c0_2 = arith.constant 0 : index
    %c0_3 = arith.constant 0 : index
    %c0_4 = arith.constant 0 : index
    %1 = vector.load %arg3[%c0_2, %c0_3, %c0_4] : memref<8x128x8xbf16, #tpu.memory_space<vmem>>, vector<8x128x8xbf16>
    %cst = arith.constant dense<0.000000e+00> : vector<8x8x128xf32>
    %2 = tpu.matmul %0, %1, %cst {dimension_numbers = #tpu.dot_dimension_numbers<[2], [2], [1], [1], [0, 0, 0, 1, 1, 1], [0], [0]>} : vector<8x8x8xbf16>, vector<8x128x8xbf16>, vector<8x8x128xf32> -> vector<8x8x128xf32>
    %c0_5 = arith.constant 0 : index
    %c0_6 = arith.constant 0 : index
    %c0_7 = arith.constant 0 : index
    %3 = vector.load %arg4[%c0_5, %c0_6, %c0_7] : memref<8x1x128xf32, #tpu.memory_space<vmem>>, vector<8x1x128xf32>
    %4 = vector.broadcast %3 : vector<8x1x128xf32> to vector<8x8x128xf32>
    %5 = arith.addf %2, %4 : vector<8x8x128xf32>
    %c0_8 = arith.constant 0 : index
    %c0_9 = arith.constant 0 : index
    %c0_10 = arith.constant 0 : index
    %6 = vector.load %arg5[%c0_8, %c0_9, %c0_10] : memref<8x8x128xf32, #tpu.memory_space<vmem>>, vector<8x8x128xf32>
    tpu.vector_store %arg5[%c0_8, %c0_9, %c0_10], %5 {strides = array<i32>} : memref<8x8x128xf32, #tpu.memory_space<vmem>>, vector<8x8x128xf32>,
    return
  }
  func.func @transform_0(%arg0: i32, %arg1: i32) -> (i32, i32, i32) {
    %c0_i32 = arith.constant 0 : i32
    %c0_i32_0 = arith.constant 0 : i32
    %c0_i32_1 = arith.constant 0 : i32
    return %arg0, %c0_i32, %c0_i32_0 : i32, i32, i32
  }
  func.func @transform_1(%arg0: i32, %arg1: i32) -> (i32, i32, i32) {
    %c0_i32 = arith.constant 0 : i32
    %c0_i32_0 = arith.constant 0 : i32
    return %arg0, %arg1, %c0_i32 : i32, i32, i32
  }
  func.func @transform_2(%arg0: i32, %arg1: i32) -> (i32, i32, i32) {
    %c0_i32 = arith.constant 0 : i32
    %c0_i32_0 = arith.constant 0 : i32
    return %arg0, %c0_i32, %arg1 : i32, i32, i32
  }
  func.func @transform_3(%arg0: i32, %arg1: i32) -> (i32, i32, i32) {
    %c0_i32 = arith.constant 0 : i32
    %c0_i32_0 = arith.constant 0 : i32
    return %arg0, %c0_i32, %arg1 : i32, i32, i32
  }
}

</mosaic_0001>

<bundles_post_ra>
// kernel: tpu_custom_call.1
= control target key start
LH: loop header
LB: loop body
LE: loop exit
PB: predicated region body
PF: predicated region fallthrough
CT: control target
= control target key end

     0   :  { %v1494_v1 = vmov 0.0   ;;  %vm248_vm0 = vcmask 64512   ;;  %vm1495_vm1 = vmmov 0   ;;  %s1923_s0 = inlined_call_operand.vmem [shape: bf16[8,8,8], index: 0, kind: input, shape index: {}]   ;;  %s1924_s1 = inlined_call_operand.vmem [shape: bf16[8,128,8], index: 1, kind: input, shape index: {}]   ;;  %s1925_s2 = inlined_call_operand.vmem [shape: f32[8,1,128], index: 2, kind: input, shape index: {}]   ;;  %s1926_s3 = inlined_call_operand.hbm [shape: f32[8,8,128], index: 3, kind: output, shape index: {}]  }
   0x1   :  { %v1406_v0 = vld [vmem:[%s1924_s1] sm:$0xff]   ;;  %1241 = vmatprep.subr.bf16.mxu0 %v1494_v1  ;;  %1261 = vmatprep.subr.bf16.mxu1 %v1494_v1  ;;  %v1408_v5 = vld [vmem:[%s1924_s1 + $0x8] sm:$0xff]   ;;  %v1410_v9 = vld [vmem:[%s1924_s1 + $0x10] sm:$0xff]  }
   0x2   :  { %v1407_v2 = vld [vmem:[%s1924_s1 + $0x40] sm:$0xff]   ;;  %v253_v3 = vsel %vm248_vm0, %v1406_v0, 0  ;;  %v1409_v6 = vld [vmem:[%s1924_s1 + $0x48] sm:$0xff]   ;;  %v256_v7 = vsel %vm248_vm0, %v1408_v5, 0  ;;  %v1411_v10 = vld [vmem:[%s1924_s1 + $0x50] sm:$0xff]   ;;  %v259_v11 = vsel %vm248_vm0, %v1410_v9, 0  ;;  %1257 = vmatprep.mubr.msk.bf16.mxu0 %vm1495_vm1, %v1494_v1  ;;  %1277 = vmatprep.mubr.msk.bf16.mxu1 %vm1495_vm1, %v1494_v1 }
   0x3   :  { %1242 = vmatpush3.bf16.xpose.msra.mxu0 %v253_v3  ;;  %v360_v4 = vsel %vm248_vm0, %v1407_v2, 0  ;;  %v363_v8 = vsel %vm248_vm0, %v1409_v6, 0  ;;  %v366_v12 = vsel %vm248_vm0, %v1411_v10, 0  ;;  %v1412_v13 = vld [vmem:[%s1924_s1 + $0x18] sm:$0xff]   ;;  %v1414_v17 = vld [vmem:[%s1924_s1 + $0x20] sm:$0xff]   ;;  %v1416_v21 = vld [vmem:[%s1924_s1 + $0x28] sm:$0xff]  }
   0x4   :  { %1262 = vmatpush3.bf16.xpose.msra.mxu1 %v360_v4  ;;  %1243 = vmatprep.subr.bf16.mxu0 %v1494_v1  ;;  %v1413_v14 = vld [vmem:[%s1924_s1 + $0x58] sm:$0xff]   ;;  %v262_v15 = vsel %vm248_vm0, %v1412_v13, 0  ;;  %v1415_v18 = vld [vmem:[%s1924_s1 + $0x60] sm:$0xff]   ;;  %v265_v19 = vsel %vm248_vm0, %v1414_v17, 0  ;;  %v1417_v22 = vld [vmem:[%s1924_s1 + $0x68] sm:$0xff]   ;;  %v268_v23 = vsel %vm248_vm0, %v1416_v21, 0 }
   0x5   :  { %1263 = vmatprep.subr.bf16.mxu1 %v1494_v1  ;;  %v369_v16 = vsel %vm248_vm0, %v1413_v14, 0  ;;  %v372_v20 = vsel %vm248_vm0, %v1415_v18, 0  ;;  %v375_v24 = vsel %vm248_vm0, %v1417_v22, 0  ;;  %v1418_v25 = vld [vmem:[%s1924_s1 + $0x30] sm:$0xff]   ;;  %v1420_v29 = vld [vmem:[%s1924_s1 + $0x38] sm:$0xff]   ;;  %v1422_v33 = vld [vmem:[%s1924_s1 + $0x80] sm:$0xff]  }
   0x6   :  { %v1419_v26 = vld [vmem:[%s1924_s1 + $0x70] sm:$0xff]   ;;  %v271_v27 = vsel %vm248_vm0, %v1418_v25, 0  ;;  %v1421_v30 = vld [vmem:[%s1924_s1 + $0x78] sm:$0xff]   ;;  %v274_v31 = vsel %vm248_vm0, %v1420_v29, 0  ;;  %v1423_v34 = vld [vmem:[%s1924_s1 + $0xc0] sm:$0xff]  }
   0x7   :  { %v378_v28 = vsel %vm248_vm0, %v1419_v26, 0  ;;  %v381_v32 = vsel %vm248_vm0, %v1421_v30, 0 }
   0xb   :  { %1244 = vmatpush3.bf16.xpose.msra.mxu0 %v256_v7 }
   0xc   :  { %1264 = vmatpush3.bf16.xpose.msra.mxu1 %v363_v8  ;;  %1245 = vmatprep.subr.bf16.mxu0 %v1494_v1 }
   0xd   :  { %1265 = vmatprep.subr.bf16.mxu1 %v1494_v1 }
  0x13   :  { %1246 = vmatpush3.bf16.xpose.msra.mxu0 %v259_v11 }
  0x14   :  { %1266 = vmatpush3.bf16.xpose.msra.mxu1 %v366_v12  ;;  %1247 = vmatprep.subr.bf16.mxu0 %v1494_v1 }
  0x15   :  { %1267 = vmatprep.subr.bf16.mxu1 %v1494_v1 }
  0x1b   :  { %1248 = vmatpush3.bf16.xpose.msra.mxu0 %v262_v15 }
  0x1c   :  { %1268 = vmatpush3.bf16.xpose.msra.mxu1 %v369_v16  ;;  %1249 = vmatprep.subr.bf16.mxu0 %v1494_v1 }
  0x1d   :  { %1269 = vmatprep.subr.bf16.mxu1 %v1494_v1 }
  0x23   :  { %1250 = vmatpush3.bf16.xpose.msra.mxu0 %v265_v19 }
  0x24   :  { %1270 = vmatpush3.bf16.xpose.msra.mxu1 %v372_v20  ;;  %1251 = vmatprep.subr.bf16.mxu0 %v1494_v1 }
  0x25   :  { %1271 = vmatprep.subr.bf16.mxu1 %v1494_v1 }
  0x2b   :  { %1252 = vmatpush3.bf16.xpose.msra.mxu0 %v268_v23 }
  0x2c   :  { %1272 = vmatpush3.bf16.xpose.msra.mxu1 %v375_v24  ;;  %1253 = vmatprep.subr.bf16.mxu0 %v1494_v1 }
  0x2d   :  { %1273 = vmatprep.subr.bf16.mxu1 %v1494_v1 }
  0x33   :  { %1254 = vmatpush3.bf16.xpose.msra.mxu0 %v271_v27 }
  0x34   :  { %1274 = vmatpush3.bf16.xpose.msra.mxu1 %v378_v28  ;;  %1255 = vmatprep.subr.bf16.mxu0 %v1494_v1 }
  0x35   :  { %1275 = vmatprep.subr.bf16.mxu1 %v1494_v1 }
  0x3b   :  { %1256 = vmatpush3.bf16.xpose.msra.mxu0 %v274_v31 }
  0x3c   :  { %1276 = vmatpush3.bf16.xpose.msra.mxu1 %v381_v32  ;;  %1281 = vmatprep.subr.bf16.mxu0 %v1494_v1 }
  0x3d   :  { %1301 = vmatprep.subr.bf16.mxu1 %v1494_v1 }
  0x3e   :  { %8 = vsyncpa [#allocation3], 0  ;;  %v16_v35 = vld [vmem:[%s1923_s0] sm:$0xf]  ;;  %v17_v36 = vld [vmem:[%s1923_s0 + $0x4] sm:$0xf] }
  0x3f   :  { %v467_v37 = vsel %vm248_vm0, %v1422_v33, 0  ;;  %v574_v38 = vsel %vm248_vm0, %v1423_v34, 0  ;;  %v1424_v39 = vld [vmem:[%s1924_s1 + $0x88] sm:$0xff]   ;;  %v1426_v43 = vld [vmem:[%s1924_s1 + $0x90] sm:$0xff]   ;;  %v1428_v47 = vld [vmem:[%s1924_s1 + $0x98] sm:$0xff]   ;;  %s1496_s6 = smov [#allocation2]  }
  0x40   :  { %v1425_v40 = vld [vmem:[%s1924_s1 + $0xc8] sm:$0xff]   ;;  %v470_v41 = vsel %vm248_vm0, %v1424_v39, 0  ;;  %v1427_v44 = vld [vmem:[%s1924_s1 + $0xd0] sm:$0xff]   ;;  %v473_v45 = vsel %vm248_vm0, %v1426_v43, 0  ;;  %v1429_v48 = vld [vmem:[%s1924_s1 + $0xd8] sm:$0xff]   ;;  %v476_v49 = vsel %vm248_vm0, %v1428_v47, 0 }
  0x41   :  { %v577_v42 = vsel %vm248_vm0, %v1425_v40, 0  ;;  %v580_v46 = vsel %vm248_vm0, %v1427_v44, 0  ;;  %v583_v50 = vsel %vm248_vm0, %v1429_v48, 0  ;;  %v1430_v51 = vld [vmem:[%s1924_s1 + $0xa0] sm:$0xff]   ;;  %v1432_v55 = vld [vmem:[%s1924_s1 + $0xa8] sm:$0xff]   ;;  %v1434_v59 = vld [vmem:[%s1924_s1 + $0xb0] sm:$0xff]  }
  0x42   :  { %1258 = vmatmul.mubr.msk.bf16.vlgmr.msra.gmra.mrb[0].mxu0 %vm248_vm0, %v16_v35  ;;  %v1431_v52 = vld [vmem:[%s1924_s1 + $0xe0] sm:$0xff]   ;;  %v479_v53 = vsel %vm248_vm0, %v1430_v51, 0  ;;  %v1433_v56 = vld [vmem:[%s1924_s1 + $0xe8] sm:$0xff]   ;;  %v482_v57 = vsel %vm248_vm0, %v1432_v55, 0  ;;  %v1435_v60 = vld [vmem:[%s1924_s1 + $0xf0] sm:$0xff]   ;;  %v485_v61 = vsel %vm248_vm0, %v1434_v59, 0 }
  0x43   :  { %1278 = vmatmul.mubr.msk.bf16.vlgmr.msra.gmra.mrb[0].mxu1 %vm248_vm0, %v17_v36  ;;  %1282 = vmatpush3.bf16.xpose.msra.mxu0 %v467_v37  ;;  %v586_v54 = vsel %vm248_vm0, %v1431_v52, 0  ;;  %v589_v58 = vsel %vm248_vm0, %v1433_v56, 0  ;;  %v592_v62 = vsel %vm248_vm0, %v1435_v60, 0  ;;  %v1436_v63 = vld [vmem:[%s1924_s1 + $0xb8] sm:$0xff]   ;;  %v1438_v4 = vld [vmem:[%s1924_s1 + $0x100] sm:$0xff]   ;;  %v1440_v10 = vld [vmem:[%s1924_s1 + $0x108] sm:$0xff]  }
  0x44   :  { %1302 = vmatpush3.bf16.xpose.msra.mxu1 %v574_v38  ;;  %1283 = vmatprep.subr.bf16.mxu0 %v1494_v1  ;;  %v1437_v0 = vld [vmem:[%s1924_s1 + $0xf8] sm:$0xff]   ;;  %v488_v2 = vsel %vm248_vm0, %v1436_v63, 0  ;;  %v1439_v5 = vld [vmem:[%s1924_s1 + $0x140] sm:$0xff]   ;;  %v18_v6 = vld [vmem:[%s1923_s0 + $0x8] sm:$0xf]  ;;  %v681_v8 = vsel %vm248_vm0, %v1438_v4, 0 }
  0x45   :  { %1303 = vmatprep.subr.bf16.mxu1 %v1494_v1  ;;  %1297 = vmatprep.mubr.msk.bf16.mxu0 %vm1495_vm1, %v1494_v1  ;;  %v595_v3 = vsel %vm248_vm0, %v1437_v0, 0  ;;  %v19_v7 = vld [vmem:[%s1923_s0 + $0xc] sm:$0xf]  ;;  %v788_v9 = vsel %vm248_vm0, %v1439_v5, 0  ;;  %v684_v12 = vsel %vm248_vm0, %v1440_v10, 0  ;;  %v1442_v14 = vld [vmem:[%s1924_s1 + $0x110] sm:$0xff]  }
  0x46   :  { %1317 = vmatprep.mubr.msk.bf16.mxu1 %vm1495_vm1, %v1494_v1  ;;  %v1441_v11 = vld [vmem:[%s1924_s1 + $0x148] sm:$0xff]   ;;  %v1443_v15 = vld [vmem:[%s1924_s1 + $0x150] sm:$0xff]   ;;  %v687_v16 = vsel %vm248_vm0, %v1442_v14, 0  ;;  %v1444_v18 = vld [vmem:[%s1924_s1 + $0x118] sm:$0xff]   ;;  %s1078_s7 = sshll.u32 %s1496_s6, 4  ;;  %s1079_s7 = int_to_ptr.vmem [resolvable:$true] %s1078_s7 }
  0x47   :  { %v791_v13 = vsel %vm248_vm0, %v1441_v11, 0  ;;  %v794_v17 = vsel %vm248_vm0, %v1443_v15, 0  ;;  %v1445_v19 = vld [vmem:[%s1924_s1 + $0x158] sm:$0xff]   ;;  %v690_v20 = vsel %vm248_vm0, %v1444_v18, 0  ;;  %v1446_v22 = vld [vmem:[%s1924_s1 + $0x120] sm:$0xff]   ;;  %v1448_v26 = vld [vmem:[%s1924_s1 + $0x128] sm:$0xff]   ;;  %p1475_p1 = scmp.lt.s32.totalorder %s1079_s7, %s1079_s7 }
  0x48   :  { %v797_v21 = vsel %vm248_vm0, %v1445_v19, 0  ;;  %v1447_v23 = vld [vmem:[%s1924_s1 + $0x160] sm:$0xff]   ;;  %v693_v24 = vsel %vm248_vm0, %v1446_v22, 0  ;;  %v1449_v27 = vld [vmem:[%s1924_s1 + $0x168] sm:$0xff]   ;;  %v696_v28 = vsel %vm248_vm0, %v1448_v26, 0  ;;  %v1450_v30 = vld [vmem:[%s1924_s1 + $0x130] sm:$0xff]  }
  0x49   :  { %v800_v25 = vsel %vm248_vm0, %v1447_v23, 0  ;;  %v803_v29 = vsel %vm248_vm0, %v1449_v27, 0  ;;  %v1451_v31 = vld [vmem:[%s1924_s1 + $0x170] sm:$0xff]   ;;  %v699_v32 = vsel %vm248_vm0, %v1450_v30, 0  ;;  %v1452_v34 = vld [vmem:[%s1924_s1 + $0x138] sm:$0xff]   ;;  %v1454_v38 = vld [vmem:[%s1924_s1 + $0x180] sm:$0xff]  }
  0x4a   :  { %v806_v33 = vsel %vm248_vm0, %v1451_v31, 0  ;;  %v1453_v35 = vld [vmem:[%s1924_s1 + $0x178] sm:$0xff]   ;;  %v702_v36 = vsel %vm248_vm0, %v1452_v34, 0  ;;  %v1455_v39 = vld [vmem:[%s1924_s1 + $0x1c0] sm:$0xff]   ;;  %v20_v40 = vld [vmem:[%s1923_s0 + $0x10] sm:$0xf] }
  0x4b   :  { %1284 = vmatpush3.bf16.xpose.msra.mxu0 %v470_v41  ;;  %v809_v37 = vsel %vm248_vm0, %v1453_v35, 0  ;;  %v21_v41 = vld [vmem:[%s1923_s0 + $0x14] sm:$0xf]  ;;  %v1002_v43 = vsel %vm248_vm0, %v1455_v39, 0  ;;  %v1456_v44 = vld [vmem:[%s1924_s1 + $0x188] sm:$0xff]   ;;  %v1460_v52 = vld [vmem:[%s1924_s1 + $0x198] sm:$0xff]  }
  0x4c   :  { %1304 = vmatpush3.bf16.xpose.msra.mxu1 %v577_v42  ;;  %1285 = vmatprep.subr.bf16.mxu0 %v1494_v1  ;;  %v895_v42 = vsel %vm248_vm0, %v1454_v38, 0  ;;  %v1458_v48 = vld [vmem:[%s1924_s1 + $0x190] sm:$0xff]   ;;  %v1462_v56 = vld [vmem:[%s1924_s1 + $0x1a0] sm:$0xff]   ;;  %v1464_v60 = vld [vmem:[%s1924_s1 + $0x1a8] sm:$0xff]   ;;  %s1470_s10 = scalar_lea.vmem %s1079_s7, 1024 }
  0x4d   :  { %1305 = vmatprep.subr.bf16.mxu1 %v1494_v1  ;;  %v1466_v0 = vld [vmem:[%s1924_s1 + $0x1b0] sm:$0xff]   ;;  %v1468_v5 = vld [vmem:[%s1924_s1 + $0x1b8] sm:$0xff]   ;;  %v1090_v11 = vld [vmem:[%s1925_s2 + $0x1] ss:$0 sm:$0xff]  ;;  %p1471_p0 = scmp.ne.s32.totalorder %s1079_s7, %s1470_s10  ;;  %p1476_p2 = scmp.lt.s32.totalorder %s1470_s10, %s1470_s10 }
  0x4e   :  { %v23_v10 = vld [vmem:[%s1923_s0 + $0x1c] sm:$0xf]  ;;  %v1091_v22 = vld [vmem:[%s1925_s2 + $0x2] ss:$0 sm:$0xff]  ;;  %v1092_v23 = vld [vmem:[%s1925_s2 + $0x3] ss:$0 sm:$0xff] }
  0x4f   :  { %v1093_v34 = vld [vmem:[%s1925_s2 + $0x4] ss:$0 sm:$0xff]  ;;  %v1094_v35 = vld [vmem:[%s1925_s2 + $0x5] ss:$0 sm:$0xff]  ;;  %p1477_p3 = por %p1476_p2, %p1475_p1 }
  0x51   :  { %p1478_p4 = pnand %p1477_p3, %p1471_p0 }
  0x53   :  { %1286 = vmatpush3.bf16.xpose.msra.mxu0 %v473_v45  ;;  %v1457_v45 = vld [vmem:[%s1924_s1 + $0x1c8] sm:$0xff]  }
  0x54   :  { %1306 = vmatpush3.bf16.xpose.msra.mxu1 %v580_v46  ;;  %1287 = vmatprep.subr.bf16.mxu0 %v1494_v1  ;;  %v898_v46 = vsel %vm248_vm0, %v1456_v44, 0  ;;  %v1005_v47 = vsel %vm248_vm0, %v1457_v45, 0 }
  0x55   :  { %1307 = vmatprep.subr.bf16.mxu1 %v1494_v1 }
  0x5b   :  { %1288 = vmatpush3.bf16.xpose.msra.mxu0 %v476_v49  ;;  %v1459_v49 = vld [vmem:[%s1924_s1 + $0x1d0] sm:$0xff]  }
  0x5c   :  { %1308 = vmatpush3.bf16.xpose.msra.mxu1 %v583_v50  ;;  %1289 = vmatprep.subr.bf16.mxu0 %v1494_v1  ;;  %v901_v50 = vsel %vm248_vm0, %v1458_v48, 0  ;;  %v1008_v51 = vsel %vm248_vm0, %v1459_v49, 0 }
  0x5d   :  { %1309 = vmatprep.subr.bf16.mxu1 %v1494_v1 }
  0x63   :  { %1290 = vmatpush3.bf16.xpose.msra.mxu0 %v479_v53  ;;  %v1461_v53 = vld [vmem:[%s1924_s1 + $0x1d8] sm:$0xff]  }
  0x64   :  { %1310 = vmatpush3.bf16.xpose.msra.mxu1 %v586_v54  ;;  %1291 = vmatprep.subr.bf16.mxu0 %v1494_v1  ;;  %v904_v54 = vsel %vm248_vm0, %v1460_v52, 0  ;;  %v1011_v55 = vsel %vm248_vm0, %v1461_v53, 0 }
  0x65   :  { %1311 = vmatprep.subr.bf16.mxu1 %v1494_v1 }
  0x6b   :  { %1292 = vmatpush3.bf16.xpose.msra.mxu0 %v482_v57  ;;  %v1463_v57 = vld [vmem:[%s1924_s1 + $0x1e0] sm:$0xff]  }
  0x6c   :  { %1312 = vmatpush3.bf16.xpose.msra.mxu1 %v589_v58  ;;  %1293 = vmatprep.subr.bf16.mxu0 %v1494_v1  ;;  %v907_v58 = vsel %vm248_vm0, %v1462_v56, 0  ;;  %v1014_v59 = vsel %vm248_vm0, %v1463_v57, 0 }
  0x6d   :  { %1313 = vmatprep.subr.bf16.mxu1 %v1494_v1 }
  0x73   :  { %1294 = vmatpush3.bf16.xpose.msra.mxu0 %v485_v61  ;;  %v1465_v61 = vld [vmem:[%s1924_s1 + $0x1e8] sm:$0xff]  }
  0x74   :  { %1314 = vmatpush3.bf16.xpose.msra.mxu1 %v592_v62  ;;  %1295 = vmatprep.subr.bf16.mxu0 %v1494_v1  ;;  %v910_v62 = vsel %vm248_vm0, %v1464_v60, 0  ;;  %v1017_v63 = vsel %vm248_vm0, %v1465_v61, 0 }
  0x75   :  { %1315 = vmatprep.subr.bf16.mxu1 %v1494_v1 }
  0x7b   :  { %1296 = vmatpush3.bf16.xpose.msra.mxu0 %v488_v2  ;;  %v1467_v2 = vld [vmem:[%s1924_s1 + $0x1f0] sm:$0xff]  }
  0x7c   :  { %1316 = vmatpush3.bf16.xpose.msra.mxu1 %v595_v3  ;;  %1321 = vmatprep.subr.bf16.mxu0 %v1494_v1  ;;  %v913_v3 = vsel %vm248_vm0, %v1466_v0, 0  ;;  %v1020_v4 = vsel %vm248_vm0, %v1467_v2, 0 }
  0x7d   :  { %1341 = vmatprep.subr.bf16.mxu1 %v1494_v1 }
  0x82   :  { %1298 = vmatmul.mubr.msk.bf16.vlgmr.msra.gmra.mrb[4].mxu0 %vm248_vm0, %v18_v6  ;;  %v1469_v6 = vld [vmem:[%s1924_s1 + $0x1f8] sm:$0xff]  }
  0x83   :  { %1318 = vmatmul.mubr.msk.bf16.vlgmr.msra.gmra.mrb[4].mxu1 %vm248_vm0, %v19_v7  ;;  %1322 = vmatpush3.bf16.xpose.msra.mxu0 %v681_v8  ;;  %v916_v7 = vsel %vm248_vm0, %v1468_v5, 0  ;;  %v1023_v8 = vsel %vm248_vm0, %v1469_v6, 0 }
  0x84   :  { %1342 = vmatpush3.bf16.xpose.msra.mxu1 %v788_v9  ;;  %1323 = vmatprep.subr.bf16.mxu0 %v1494_v1  ;;  %v22_v9 = vld [vmem:[%s1923_s0 + $0x18] sm:$0xf] }
  0x85   :  { %1343 = vmatprep.subr.bf16.mxu1 %v1494_v1  ;;  %1337 = vmatprep.mubr.msk.bf16.mxu0 %vm1495_vm1, %v1494_v1 }
  0x86   :  { %1357 = vmatprep.mubr.msk.bf16.mxu1 %vm1495_vm1, %v1494_v1 }
  0x8b   :  { %1324 = vmatpush3.bf16.xpose.msra.mxu0 %v684_v12 }
  0x8c   :  { %1344 = vmatpush3.bf16.xpose.msra.mxu1 %v791_v13  ;;  %1325 = vmatprep.subr.bf16.mxu0 %v1494_v1 }
  0x8d   :  { %1345 = vmatprep.subr.bf16.mxu1 %v1494_v1 }
  0x93   :  { %1326 = vmatpush3.bf16.xpose.msra.mxu0 %v687_v16 }
  0x94   :  { %1346 = vmatpush3.bf16.xpose.msra.mxu1 %v794_v17  ;;  %1327 = vmatprep.subr.bf16.mxu0 %v1494_v1 }
  0x95   :  { %1347 = vmatprep.subr.bf16.mxu1 %v1494_v1 }
  0x9b   :  { %1328 = vmatpush3.bf16.xpose.msra.mxu0 %v690_v20 }
  0x9c   :  { %1348 = vmatpush3.bf16.xpose.msra.mxu1 %v797_v21  ;;  %1329 = vmatprep.subr.bf16.mxu0 %v1494_v1 }
  0x9d   :  { %1349 = vmatprep.subr.bf16.mxu1 %v1494_v1 }
  0xa3   :  { %1330 = vmatpush3.bf16.xpose.msra.mxu0 %v693_v24 }
  0xa4   :  { %1350 = vmatpush3.bf16.xpose.msra.mxu1 %v800_v25  ;;  %1331 = vmatprep.subr.bf16.mxu0 %v1494_v1 }
  0xa5   :  { %1351 = vmatprep.subr.bf16.mxu1 %v1494_v1 }
  0xab   :  { %1332 = vmatpush3.bf16.xpose.msra.mxu0 %v696_v28 }
  0xac   :  { %1352 = vmatpush3.bf16.xpose.msra.mxu1 %v803_v29  ;;  %1333 = vmatprep.subr.bf16.mxu0 %v1494_v1 }
  0xad   :  { %1353 = vmatprep.subr.bf16.mxu1 %v1494_v1 }
  0xb3   :  { %1334 = vmatpush3.bf16.xpose.msra.mxu0 %v699_v32 }
  0xb4   :  { %1354 = vmatpush3.bf16.xpose.msra.mxu1 %v806_v33  ;;  %1335 = vmatprep.subr.bf16.mxu0 %v1494_v1 }
  0xb5   :  { %1355 = vmatprep.subr.bf16.mxu1 %v1494_v1 }
  0xbb   :  { %1336 = vmatpush3.bf16.xpose.msra.mxu0 %v702_v36 }
  0xbc   :  { %1356 = vmatpush3.bf16.xpose.msra.mxu1 %v809_v37  ;;  %1361 = vmatprep.subr.bf16.mxu0 %v1494_v1 }
  0xbd   :  { %1381 = vmatprep.subr.bf16.mxu1 %v1494_v1 }
  0xc2   :  { %1338 = vmatmul.mubr.msk.bf16.vlgmr.msra.gmra.mrb[8].mxu0 %vm248_vm0, %v20_v40 }
  0xc3   :  { %1358 = vmatmul.mubr.msk.bf16.vlgmr.msra.gmra.mrb[8].mxu1 %vm248_vm0, %v21_v41  ;;  %1362 = vmatpush3.bf16.xpose.msra.mxu0 %v895_v42 }
  0xc4   :  { %1382 = vmatpush3.bf16.xpose.msra.mxu1 %v1002_v43  ;;  %1363 = vmatprep.subr.bf16.mxu0 %v1494_v1 }
  0xc5   :  { %1383 = vmatprep.subr.bf16.mxu1 %v1494_v1  ;;  %1377 = vmatprep.mubr.msk.bf16.mxu0 %vm1495_vm1, %v1494_v1 }
  0xc6   :  { %1397 = vmatprep.mubr.msk.bf16.mxu1 %vm1495_vm1, %v1494_v1 }
  0xcb   :  { %1364 = vmatpush3.bf16.xpose.msra.mxu0 %v898_v46  ;;  %v1095_v46 = vld [vmem:[%s1925_s2 + $0x6] ss:$0 sm:$0xff] }
  0xcc   :  { %1384 = vmatpush3.bf16.xpose.msra.mxu1 %v1005_v47  ;;  %1365 = vmatprep.subr.bf16.mxu0 %v1494_v1  ;;  %v1096_v47 = vld [vmem:[%s1925_s2 + $0x7] ss:$0 sm:$0xff] }
  0xcd   :  { %1385 = vmatprep.subr.bf16.mxu1 %v1494_v1 }
  0xd3   :  { %1366 = vmatpush3.bf16.xpose.msra.mxu0 %v901_v50 }
  0xd4   :  { %1386 = vmatpush3.bf16.xpose.msra.mxu1 %v1008_v51  ;;  %1367 = vmatprep.subr.bf16.mxu0 %v1494_v1 }
  0xd5   :  { %1387 = vmatprep.subr.bf16.mxu1 %v1494_v1 }
  0xdb   :  { %1368 = vmatpush3.bf16.xpose.msra.mxu0 %v904_v54 }
  0xdc   :  { %1388 = vmatpush3.bf16.xpose.msra.mxu1 %v1011_v55  ;;  %1369 = vmatprep.subr.bf16.mxu0 %v1494_v1 }
  0xdd   :  { %1389 = vmatprep.subr.bf16.mxu1 %v1494_v1 }
  0xe3   :  { %1370 = vmatpush3.bf16.xpose.msra.mxu0 %v907_v58 }
  0xe4   :  { %1390 = vmatpush3.bf16.xpose.msra.mxu1 %v1014_v59  ;;  %1371 = vmatprep.subr.bf16.mxu0 %v1494_v1 }
  0xe5   :  { %1391 = vmatprep.subr.bf16.mxu1 %v1494_v1 }
  0xeb   :  { %1372 = vmatpush3.bf16.xpose.msra.mxu0 %v910_v62 }
  0xec   :  { %1392 = vmatpush3.bf16.xpose.msra.mxu1 %v1017_v63  ;;  %1373 = vmatprep.subr.bf16.mxu0 %v1494_v1 }
  0xed   :  { %1393 = vmatprep.subr.bf16.mxu1 %v1494_v1 }
  0xf3   :  { %1374 = vmatpush3.bf16.xpose.msra.mxu0 %v913_v3 }
  0xf4   :  { %1394 = vmatpush3.bf16.xpose.msra.mxu1 %v1020_v4  ;;  %1375 = vmatprep.subr.bf16.mxu0 %v1494_v1 }
  0xf5   :  { %1395 = vmatprep.subr.bf16.mxu1 %v1494_v1  ;;  %v1089_v1 = vld [vmem:[%s1925_s2] ss:$0 sm:$0xff] }
  0xfb   :  { %1376 = vmatpush3.bf16.xpose.msra.mxu0 %v916_v7 }
  0xfc   :  { %1396 = vmatpush3.bf16.xpose.msra.mxu1 %v1023_v8 }
 0x102   :  { %1378 = vmatmul.mubr.msk.bf16.vlgmr.msra.gmra.mrb[12].mxu0 %vm248_vm0, %v22_v9 }
 0x103   :  { %1398 = vmatmul.mubr.msk.bf16.vlgmr.msra.gmra.mrb[12].mxu1 %vm248_vm0, %v23_v10 }
 0x115   :  { %v310_v12 = vpop.f32.mrb[0].mxu0 }
 0x116   :  { %v311_v13 = vadd.f32 %v1089_v1, %v310_v12  ;;  %v417_v14 = vpop.f32.mrb[0].mxu1  ;;  %v1259_v15 = vpop.f32.mrb[1].mxu0 }
 0x117   :  { %v418_v16 = vadd.f32 %v1090_v11, %v417_v14  ;;  %v1279_v17 = vpop.f32.mrb[1].mxu1  ;;  %v313_v18 = vpop.f32.mrb[2].mxu0 }
 0x118   :  { %1065 = vst [vmem:[#allocation2] sm:$0xff] %v311_v13  ;;  %v420_v19 = vpop.f32.mrb[2].mxu1  ;;  %v1260_v20 = vpop.f32.mrb[3].mxu0 }
 0x119   :  { %1066 = vst [vmem:[#allocation2 + $0x8] sm:$0xff] %v418_v16  ;;  %v1280_v21 = vpop.f32.mrb[3].mxu1 }
 0x155   :  { %v524_v24 = vpop.f32.mrb[4].mxu0 }
 0x156   :  { %v525_v25 = vadd.f32 %v1091_v22, %v524_v24  ;;  %v631_v26 = vpop.f32.mrb[4].mxu1  ;;  %v1299_v27 = vpop.f32.mrb[5].mxu0 }
 0x157   :  { %v632_v28 = vadd.f32 %v1092_v23, %v631_v26  ;;  %v1319_v29 = vpop.f32.mrb[5].mxu1  ;;  %v527_v30 = vpop.f32.mrb[6].mxu0 }
 0x158   :  { %1067 = vst [vmem:[#allocation2 + $0x10] sm:$0xff] %v525_v25  ;;  %v634_v31 = vpop.f32.mrb[6].mxu1  ;;  %v1300_v32 = vpop.f32.mrb[7].mxu0 }
 0x159   :  { %1068 = vst [vmem:[#allocation2 + $0x18] sm:$0xff] %v632_v28  ;;  %v1320_v33 = vpop.f32.mrb[7].mxu1 }
 0x195   :  { %v738_v36 = vpop.f32.mrb[8].mxu0 }
 0x196   :  { %v739_v37 = vadd.f32 %v1093_v34, %v738_v36  ;;  %v845_v38 = vpop.f32.mrb[8].mxu1  ;;  %v1339_v39 = vpop.f32.mrb[9].mxu0 }
 0x197   :  { %v846_v40 = vadd.f32 %v1094_v35, %v845_v38  ;;  %v1359_v41 = vpop.f32.mrb[9].mxu1  ;;  %v741_v42 = vpop.f32.mrb[10].mxu0 }
 0x198   :  { %1069 = vst [vmem:[#allocation2 + $0x20] sm:$0xff] %v739_v37  ;;  %v848_v43 = vpop.f32.mrb[10].mxu1  ;;  %v1340_v44 = vpop.f32.mrb[11].mxu0 }
 0x199   :  { %1070 = vst [vmem:[#allocation2 + $0x28] sm:$0xff] %v846_v40  ;;  %v1360_v45 = vpop.f32.mrb[11].mxu1 }
 0x1d5   :  { %v952_v48 = vpop.f32.mrb[12].mxu0 }
 0x1d6   :  { %v953_v49 = vadd.f32 %v1095_v46, %v952_v48  ;;  %v1059_v50 = vpop.f32.mrb[12].mxu1  ;;  %v1379_v51 = vpop.f32.mrb[13].mxu0 }
 0x1d7   :  { %v1060_v52 = vadd.f32 %v1096_v47, %v1059_v50  ;;  %v1399_v53 = vpop.f32.mrb[13].mxu1  ;;  %v955_v54 = vpop.f32.mrb[14].mxu0 }
 0x1d8   :  { %1071 = vst [vmem:[#allocation2 + $0x30] sm:$0xff] %v953_v49  ;;  %v1062_v55 = vpop.f32.mrb[14].mxu1  ;;  %v1380_v56 = vpop.f32.mrb[15].mxu0 }
 0x1d9   :  { %1072 = vst [vmem:[#allocation2 + $0x38] sm:$0xff] %v1060_v52  ;;  %v1400_v57 = vpop.f32.mrb[15].mxu1 }
 0x1da   :  { %1481 = shalt.err (!%p1478_p4)
}
 0x1db   :  { %s1482_s12 = scalar_lea.hbm %s1926_s3, 1024 }
 0x1dc   :  { %p1483_p5 = scmp.ne.s32.totalorder %s1926_s3, %s1482_s12  ;;  %p1486_p6 = scmp.lt.u32.totalorder %s1482_s12, %s1926_s3 }
 0x1de   :  { %p1488_p7 = pnand %p1486_p6, %p1483_p5 }
 0x1e0   :  { %1491 = shalt.err (!%p1488_p7)
}
 0x1e1   :  { %s1497_s17 = smov 128   ;;  %s1498_s18 = smov 8  }
 0x1e2   :  { %1084 = dma.vmem_to_hbm [thread:$0]  %s1079_s7, 1024, %s1926_s3, [#allocation3], %s1497_s17, %s1497_s17, %s1498_s18  }
 0x1e3   :  { %1492 = dma.done.wait [#allocation3], 1024  }
 0x1e4   :  { %1493 = vsyncadd [#allocation3], 4294966272 }
 0x1e5   :  { %1088 = vsyncpa [#allocation3], 1 }

</bundles_post_ra>
